<compile_context>
chip_gen: v5e
topology: v5e:2x2
jax: 0.10.0
libtpu: 0.0.40
codegen_flags: <defaults>
</compile_context>

<pallas_src>
import functools

import jax
import jax.numpy as jnp
from jax.experimental import pallas as pl
from jax.experimental.pallas import tpu as pltpu


def _triplet_kernel(a_ref, p_ref, n_ref, o_ref, acc_ref, *,
                    margin, batch, tile_b, mask_rows):
    i = pl.program_id(0)
    nt = pl.num_programs(0)

    @pl.when(i == 0)
    def _init():
        acc_ref[0, 0] = jnp.float32(0.0)

    a = a_ref[...].astype(jnp.float32)
    p = p_ref[...].astype(jnp.float32)
    n = n_ref[...].astype(jnp.float32)

    dp = a - p
    dn = a - n
    # Fused feature reduction: one cross-lane sum instead of two.
    diff = jnp.sum(dp * dp - dn * dn, axis=1, keepdims=True)     # (TB, 1)
    hinge = jnp.maximum(diff + margin, 0.0)

    if mask_rows:
        # Rows of the (partial) last block that lie past the true batch end
        # contain unspecified data; zero their contribution.  jnp.where
        # selects element-wise, so NaN/inf garbage cannot leak through.
        row = jax.lax.broadcasted_iota(jnp.int32, hinge.shape, 0) + i * tile_b
        hinge = jnp.where(row < batch, hinge, 0.0)

    acc_ref[0, 0] += jnp.sum(hinge)

    @pl.when(i == nt - 1)
    def _finalize():
        o_ref[0, 0] = acc_ref[0, 0] * (1.0 / batch)


def _choose_tile_b(B, D, itemsize):
    # 3 inputs x 2 pipeline buffers x TB*D*itemsize must fit the budget.
    budget = 16 * 1024 * 1024
    per_row = 3 * 2 * D * itemsize
    tb = (budget // per_row) // 8 * 8
    tb = max(8, min(8192, tb))          # byte budget, plus a sane row cap
    b_pad8 = ((B + 7) // 8) * 8
    return max(8, min(tb, b_pad8))      # never bigger than the (rounded) batch


def triplet_loss(anchor, pos, neg, margin=1.0, tile_b=None):
    assert anchor.shape == pos.shape == neg.shape
    B, D = anchor.shape

    if tile_b is None:
        tile_b = _choose_tile_b(B, D, jnp.dtype(anchor.dtype).itemsize)
    tb = int(tile_b)
    assert tb % 8 == 0, "tile_b must be a multiple of 8 (sublane tiling)"

    nt = (B + tb - 1) // tb             # partial last block handled in-kernel
    mask_rows = (B % tb) != 0

    kernel = functools.partial(_triplet_kernel, margin=float(margin),
                               batch=int(B), tile_b=tb, mask_rows=mask_rows)

    out = pl.pallas_call(
        kernel,
        out_shape=jax.ShapeDtypeStruct((1, 1), jnp.float32),
        grid_spec=pltpu.PrefetchScalarGridSpec(
            num_scalar_prefetch=0,
            grid=(nt,),
            in_specs=[
                pl.BlockSpec((tb, D), lambda i: (i, 0)),
                pl.BlockSpec((tb, D), lambda i: (i, 0)),
                pl.BlockSpec((tb, D), lambda i: (i, 0)),
            ],
            out_specs=pl.BlockSpec(memory_space=pltpu.MemorySpace.SMEM),
            scratch_shapes=[pltpu.SMEM((1, 1), jnp.float32)],
        ),
        compiler_params=pltpu.CompilerParams(
            dimension_semantics=("arbitrary",),       # reduction axis
            vmem_limit_bytes=32 * 1024 * 1024,
        ),
    )(anchor, pos, neg)
    return out[0, 0]


def _reference(anchor, pos, neg, margin=1.0):
    dp = jnp.sum((anchor - pos) ** 2, axis=1)
    dn = jnp.sum((anchor - neg) ** 2, axis=1)
    return jnp.mean(jnp.maximum(dp - dn + margin, 0.0))


if __name__ == "__main__":
    key = jax.random.PRNGKey(0)
    k1, k2, k3, k4, k5, k6 = jax.random.split(key, 6)

    # Case 1: the original toy shape (single tile, B == tile).
    B, D = 8, 32
    a = jax.random.normal(k1, (B, D), dtype=jnp.float32)
    p = jax.random.normal(k2, (B, D), dtype=jnp.float32)
    n = jax.random.normal(k3, (B, D), dtype=jnp.float32)
    loss = jax.block_until_ready(triplet_loss(a, p, n, margin=1.0))
    ref = _reference(a, p, n, margin=1.0)
    assert jnp.allclose(loss, ref, rtol=1e-5, atol=1e-5), (loss, ref)

    # Case 2: B not a tile multiple + multi-step grid -> exercises the
    # cross-step accumulator AND the partial-last-block masking path
    # (no wrapper padding anymore).
    B2, D2 = 20, 40
    a2 = jax.random.normal(k4, (B2, D2), dtype=jnp.float32)
    p2 = jax.random.normal(k5, (B2, D2), dtype=jnp.float32)
    n2 = jax.random.normal(k6, (B2, D2), dtype=jnp.float32)
    loss2 = jax.block_until_ready(triplet_loss(a2, p2, n2, margin=1.0, tile_b=8))
    ref2 = _reference(a2, p2, n2, margin=1.0)
    assert jnp.allclose(loss2, ref2, rtol=1e-5, atol=1e-5), (loss2, ref2)

    # Case 3: auto tile selection with a ragged batch (single partial block).
    B3, D3 = 300, 64
    ka, kb, kc = jax.random.split(k6, 3)
    a3 = jax.random.normal(ka, (B3, D3), dtype=jnp.float32)
    p3 = jax.random.normal(kb, (B3, D3), dtype=jnp.float32)
    n3 = jax.random.normal(kc, (B3, D3), dtype=jnp.float32)
    loss3 = jax.block_until_ready(triplet_loss(a3, p3, n3, margin=0.5))
    ref3 = _reference(a3, p3, n3, margin=0.5)
    assert jnp.allclose(loss3, ref3, rtol=1e-5, atol=1e-5), (loss3, ref3)

    print("KERNEL_OK")
</pallas_src>

<mosaic_0001>
module attributes {stable_mosaic.version = 11 : i64} {
  func.func @_triplet_kernel(%arg0: i32, %arg1: memref<8x32xf32, #tpu.memory_space<vmem>>, %arg2: memref<8x32xf32, #tpu.memory_space<vmem>>, %arg3: memref<8x32xf32, #tpu.memory_space<vmem>>, %arg4: memref<1x1xf32, #tpu.memory_space<smem>>, %arg5: memref<1x1xf32, #tpu.memory_space<smem>>) attributes {dimension_semantics = [#tpu.dimension_semantics<arbitrary>], iteration_bounds = array<i64: 1>, scalar_prefetch = 0 : i64, scratch_operands = 1 : i64, tpu.core_type = #tpu.core_type<tc>, window_params = [{transform_indices = @transform_0, window_bounds = array<i64: 8, 32>}, {transform_indices = @transform_1, window_bounds = array<i64: 8, 32>}, {transform_indices = @transform_2, window_bounds = array<i64: 8, 32>}, {transform_indices = @transform_3, window_bounds = array<i64: 1, 1>}]} {
    %c0_i32 = arith.constant 0 : i32
    %0 = arith.cmpi eq, %arg0, %c0_i32 : i32
    %1 = arith.extui %0 : i1 to i32
    %c0_i32_0 = arith.constant 0 : i32
    %2 = arith.cmpi ne, %1, %c0_i32_0 : i32
    scf.if %2 {
      %cst_15 = arith.constant 0.000000e+00 : f32
      %c0_16 = arith.constant 0 : index
      %c0_17 = arith.constant 0 : index
      %27 = memref.load %arg5[%c0_16, %c0_17] : memref<1x1xf32, #tpu.memory_space<smem>>
      memref.store %cst_15, %arg5[%c0_16, %c0_17] : memref<1x1xf32, #tpu.memory_space<smem>>
    } else {
    }
    %c0 = arith.constant 0 : index
    %c0_1 = arith.constant 0 : index
    %3 = vector.load %arg1[%c0, %c0_1] : memref<8x32xf32, #tpu.memory_space<vmem>>, vector<8x32xf32>
    %c0_2 = arith.constant 0 : index
    %c0_3 = arith.constant 0 : index
    %4 = vector.load %arg2[%c0_2, %c0_3] : memref<8x32xf32, #tpu.memory_space<vmem>>, vector<8x32xf32>
    %c0_4 = arith.constant 0 : index
    %c0_5 = arith.constant 0 : index
    %5 = vector.load %arg3[%c0_4, %c0_5] : memref<8x32xf32, #tpu.memory_space<vmem>>, vector<8x32xf32>
    %6 = arith.subf %3, %4 : vector<8x32xf32>
    %7 = arith.subf %3, %5 : vector<8x32xf32>
    %8 = arith.mulf %6, %6 : vector<8x32xf32>
    %9 = arith.mulf %7, %7 : vector<8x32xf32>
    %10 = arith.subf %8, %9 : vector<8x32xf32>
    %cst = arith.constant dense<0.000000e+00> : vector<8xf32>
    %11 = vector.multi_reduction <add>, %10, %cst [1] : vector<8x32xf32> to vector<8xf32>
    %12 = vector.shape_cast %11 : vector<8xf32> to vector<8x1xf32>
    %cst_6 = arith.constant 1.000000e+00 : f32
    %13 = vector.broadcast %cst_6 : f32 to vector<8x1xf32>
    %14 = arith.addf %12, %13 : vector<8x1xf32>
    %cst_7 = arith.constant 0.000000e+00 : f32
    %15 = vector.broadcast %cst_7 : f32 to vector<8x1xf32>
    %16 = arith.maximumf %14, %15 : vector<8x1xf32>
    %c0_8 = arith.constant 0 : index
    %c0_9 = arith.constant 0 : index
    %17 = memref.load %arg5[%c0_8, %c0_9] : memref<1x1xf32, #tpu.memory_space<smem>>
    %18 = vector.shape_cast %16 : vector<8x1xf32> to vector<1x8x1xf32>
    %cst_10 = arith.constant dense<0.000000e+00> : vector<1xf32>
    %19 = vector.multi_reduction <add>, %18, %cst_10 [1, 2] : vector<1x8x1xf32> to vector<1xf32>
    %20 = vector.shape_cast %19 : vector<1xf32> to vector<1x1x1xf32>
    %21 = vector.extract %20[0, 0, 0] : f32 from vector<1x1x1xf32>
    %22 = arith.addf %17, %21 : f32
    %c0_11 = arith.constant 0 : index
    %c0_12 = arith.constant 0 : index
    %23 = memref.load %arg5[%c0_11, %c0_12] : memref<1x1xf32, #tpu.memory_space<smem>>
    memref.store %22, %arg5[%c0_11, %c0_12] : memref<1x1xf32, #tpu.memory_space<smem>>
    %c0_i32_13 = arith.constant 0 : i32
    %24 = arith.cmpi eq, %arg0, %c0_i32_13 : i32
    %25 = arith.extui %24 : i1 to i32
    %c0_i32_14 = arith.constant 0 : i32
    %26 = arith.cmpi ne, %25, %c0_i32_14 : i32
    scf.if %26 {
      %c0_15 = arith.constant 0 : index
      %c0_16 = arith.constant 0 : index
      %27 = memref.load %arg5[%c0_15, %c0_16] : memref<1x1xf32, #tpu.memory_space<smem>>
      %cst_17 = arith.constant 1.250000e-01 : f32
      %28 = arith.mulf %27, %cst_17 : f32
      %c0_18 = arith.constant 0 : index
      %c0_19 = arith.constant 0 : index
      %29 = memref.load %arg4[%c0_18, %c0_19] : memref<1x1xf32, #tpu.memory_space<smem>>
      memref.store %28, %arg4[%c0_18, %c0_19] : memref<1x1xf32, #tpu.memory_space<smem>>
    } else {
    }
    return
  }
  func.func @transform_0(%arg0: i32) -> (i32, i32) {
    %c0_i32 = arith.constant 0 : i32
    %c0_i32_0 = arith.constant 0 : i32
    return %arg0, %c0_i32 : i32, i32
  }
  func.func @transform_1(%arg0: i32) -> (i32, i32) {
    %c0_i32 = arith.constant 0 : i32
    %c0_i32_0 = arith.constant 0 : i32
    return %arg0, %c0_i32 : i32, i32
  }
  func.func @transform_2(%arg0: i32) -> (i32, i32) {
    %c0_i32 = arith.constant 0 : i32
    %c0_i32_0 = arith.constant 0 : i32
    return %arg0, %c0_i32 : i32, i32
  }
  func.func @transform_3(%arg0: i32) -> (i32, i32) {
    %c0_i32 = arith.constant 0 : i32
    %c0_i32_0 = arith.constant 0 : i32
    %c0_i32_1 = arith.constant 0 : i32
    return %c0_i32, %c0_i32_0 : i32, i32
  }
}

</mosaic_0001>

<bundles_post_ra>
// kernel: tpu_custom_call.1
= control target key start
LH: loop header
LB: loop body
LE: loop exit
PB: predicated region body
PF: predicated region fallthrough
CT: control target
= control target key end

     0   :  { %8 = vsyncpa [#allocation4], 0  ;;  %s247_s0 = inlined_call_operand.hbm [shape: f32[8,32], index: 0, kind: input, shape index: {}]   ;;  %s248_s1 = inlined_call_operand.hbm [shape: f32[8,32], index: 1, kind: input, shape index: {}]   ;;  %s249_s2 = inlined_call_operand.hbm [shape: f32[8,32], index: 2, kind: input, shape index: {}]   ;;  %s250_s3 = inlined_call_operand.hbm [shape: f32[1,1], index: 3, kind: output, shape index: {}]  }
   0x1   :  { %9 = vsyncpa [#allocation7], 0  ;;  %s27_s14 = sshll.u32 %s248_s1, 4  ;;  %s28_s14 = int_to_ptr.hbm [resolvable:$true] %s27_s14 }
   0x2   :  { %10 = vsyncpa [#allocation5], 0  ;;  %s211_s15 = smov [#allocation6]   ;;  %s16_s19 = sshll.u32 %s247_s0, 4  ;;  %s17_s19 = int_to_ptr.hbm [resolvable:$true] %s16_s19 }
   0x3   :  { %s29_s16 = sshll.u32 %s211_s15, 4  ;;  %s212_s20 = smov [#allocation3]   ;;  %s30_s16 = int_to_ptr.vmem [resolvable:$true] %s29_s16 }
   0x4   :  { %32 = dma.hbm_to_vmem [thread:$0]  %s28_s14, 128, %s30_s16, [#allocation7]  }
   0x5   :  { %s18_s21 = sshll.u32 %s212_s20, 4  ;;  %s38_s24 = sshll.u32 %s249_s2, 4  ;;  %s19_s21 = int_to_ptr.vmem [resolvable:$true] %s18_s21  ;;  %s39_s24 = int_to_ptr.hbm [resolvable:$true] %s38_s24 }
   0x6   :  { %21 = dma.hbm_to_vmem [thread:$0]  %s17_s19, 128, %s19_s21, [#allocation4]  }
   0x7   :  { %s213_s1 = smov [#allocation8]  }
   0x8   :  { %s40_s25 = sshll.u32 %s213_s1, 4  ;;  %s41_s25 = int_to_ptr.vmem [resolvable:$true] %s40_s25 }
   0x9   :  { %43 = dma.hbm_to_vmem [thread:$0]  %s39_s24, 128, %s41_s25, [#allocation7]  }
   0xa   :  { %205 = dma.done.wait [#allocation4], 128  }
   0xb   :  { %206 = vsyncadd [#allocation4], 4294967168 }
   0xc   :  { %207 = dma.done.wait [#allocation7], 256  }
   0xd   :  { %208 = vsyncadd [#allocation7], 4294967040  ;;  %v62_v0 = vld [vmem:[#allocation3] sm:$0xff]  ;;  %v63_v1 = vld [vmem:[#allocation6] sm:$0xff]  ;;  %vm70_vm0 = vcmask 261120   ;;  %vm77_vm1 = vcmask 7168  }
   0xe   :  { %v64_v2 = vld [vmem:[#allocation8] sm:$0xff]  ;;  %v65_v3 = vsub.f32 %v62_v0, %v63_v1  ;;  %s103_s26 = sshll.u32 %s250_s3, 4  ;;  %s214_s29 = smov [#allocation9]   ;;  %s104_s26 = int_to_ptr.hbm [resolvable:$true] %s103_s26 }
   0xf   :  { %v66_v4 = vsub.f32 %v62_v0, %v64_v2 }
  0x10   :  { %v67_v5 = vmul.f32 %v65_v3, %v65_v3 }
  0x11   :  { %v68_v6 = vmul.f32 %v66_v4, %v66_v4 }
  0x13   :  { %v69_v7 = vsub.f32 %v67_v5, %v68_v6 }
  0x15   :  { %v71_v8 = vsel %vm70_vm0, %v69_v7, 0.0 }
  0x16   :  { %72 = vadd.xlane.f32.xlu0 %v71_v8 }
  0x89   :  { %v73_v9 = vpop.xlane.xlu0 %72 }
  0x8a   :  { %v74_v10 = vadd.f32 1.0, %v73_v9 }
  0x8c   :  { %v75_v11 = vmax.f32 %v74_v10, 0.0 }
  0x8e   :  { %v78_v12 = vsel %vm77_vm1, %v75_v11, 0.0 }
  0x8f   :  { %79 = vadd.xlane.f32.xlu0 %v78_v12 }
 0x102   :  { %v80_v13 = vpop.xlane.xlu0 %79 }
 0x103   :  { %v81_v14 = vrot.slane %v80_v13, 4 }
 0x105   :  { %v82_v15 = vadd.f32 %v81_v14, %v80_v13 }
 0x107   :  { %v83_v16 = vrot.slane %v82_v15, 2 }
 0x109   :  { %v84_v17 = vadd.f32 %v83_v16, %v82_v15 }
 0x10b   :  { %v85_v18 = vrot.slane %v84_v17, 1 }
 0x10d   :  { %v86_v19 = vadd.f32 %v85_v18, %v84_v17 }
 0x10f   :  { %115 = vpush %v86_v19 }
 0x140   :  { %s116_s27 = spop %115 }
 0x141   :  { %s95_s28 = smul.f32 0.125, %s116_s27 }
 0x143   :  { %97 = sst [smem:[#allocation9]] %s95_s28 }
 0x144   :  { %106 = dma.smem_to_hbm %s214_s29, 16, %s104_s26, [#allocation5]  }
 0x145   :  { %209 = dma.done.wait [#allocation5], 16  }
 0x146   :  { %210 = vsyncadd [#allocation5], 4294967280 }
 0x147   :  { %111 = sfence }
 0x148   :  { %112 = vsyncpa [#allocation4], 1 }
 0x149   :  { %113 = vsyncpa [#allocation7], 1 }
 0x14a   :  { %114 = vsyncpa [#allocation5], 1 }

</bundles_post_ra>
